<compile_context>
chip_gen: v5e
topology: v5e:2x2
jax: 0.10.0
libtpu: 0.0.40
codegen_flags: <defaults>
</compile_context>

<pallas_src>
import math
import functools

import jax
import jax.numpy as jnp
from jax.experimental import pallas as pl
from jax.experimental.pallas import tpu as pltpu

EPS = 1e-5          # nn.GroupNorm default eps
LANE = 128          # TPU lane width
SUBLANE = 8         # f32 sublane granularity


def _round_up(x, m):
    return ((x + m - 1) // m) * m


def _sds(start, size, stride):
    """pl.ds with optional stride (omit the kwarg when stride == 1)."""
    if stride == 1:
        return pl.ds(start, size)
    return pl.ds(start, size, stride=stride)


# ----------------------------- fused layer kernel ---------------------------- #

def _conv_gn_kernel(x_ref, w_ref, g_ref, b_ref, o_ref,
                    y_ref, stat_ref, mu_ref, istd_ref, *,
                    k, stride, step, t_out, tt, c_in_true, c_out_true,
                    eps, scale, use_residual, apply_log, use_dot):
    """Conv1d (bias-free) + GroupNorm(1) + affine + ReLU (+ residual) (+ log), fused.

    grid = (batch, phase, time_tile):
      phase 0: conv for this time tile -> y_ref slice, accumulate per-lane sum/sumsq.
      phase 1: finalize GroupNorm stats (t == 0), then normalize + epilogue + store.
    """
    c_out_pad = o_ref.shape[-1]
    p = pl.program_id(1)
    t = pl.program_id(2)

    r0 = pl.multiple_of(t * tt, SUBLANE)                       # tt is a multiple of 8
    rows = r0 + jax.lax.broadcasted_iota(jnp.int32, (tt, 1), 0)
    valid = rows < t_out                                       # mask the time padding

    # ---------------- phase 0: per-tile conv + stats accumulation ----------------
    @pl.when(jnp.logical_and(p == 0, t == 0))
    def _():
        stat_ref[...] = jnp.zeros_like(stat_ref)

    @pl.when(p == 0)
    def _():
        base = pl.multiple_of(t * (tt * stride), SUBLANE)
        acc = jnp.zeros((tt, c_out_pad), jnp.float32)
        for j in range(k):                                     # k <= 3: static unroll
            xs = x_ref[_sds(base + j, tt, stride), :]
            wj = w_ref[j]
            if use_dot:                                        # MXU path (wide contraction)
                acc = acc + jnp.dot(xs.astype(wj.dtype), wj,
                                    preferred_element_type=jnp.float32)
            else:                                              # tiny contraction: VPU path
                for c in range(c_in_true):
                    acc = acc + (xs[:, c:c + 1].astype(jnp.float32)
                                 * wj[c:c + 1, :].astype(jnp.float32))
        acc = jnp.where(valid, acc, 0.0)                       # padded rows stay exact zero
        y_ref[pl.ds(r0, tt), :] = acc
        stat_ref[0:1, :] = stat_ref[0:1, :] + jnp.sum(acc, axis=0, keepdims=True)
        stat_ref[1:2, :] = stat_ref[1:2, :] + jnp.sum(acc * acc, axis=0, keepdims=True)

    # ------------- phase 1: finalize stats once, then per-tile epilogue -------------
    @pl.when(jnp.logical_and(p == 1, t == 0))
    def _():
        # GroupNorm(num_groups=1): stats over the true (C, T) elements only.
        n = float(t_out * c_out_true)
        mean = jnp.sum(stat_ref[0:1, :]) / n
        var = jnp.sum(stat_ref[1:2, :]) / n - mean * mean      # f32 single-sweep; guarded
        var = jnp.maximum(var, 0.0)
        mu_ref[...] = jnp.broadcast_to(mean, mu_ref.shape)
        istd_ref[...] = jnp.broadcast_to(jax.lax.rsqrt(var + eps), istd_ref.shape)

    @pl.when(p == 1)
    def _():
        y = y_ref[pl.ds(r0, tt), :]
        y = (y - mu_ref[...]) * istd_ref[...]
        y = y * g_ref[...] + b_ref[...]
        y = jnp.maximum(y, 0.0)                                # ReLU
        if use_residual:                                       # skip connection from the input
            rbase = pl.multiple_of(t * (tt * step), SUBLANE)
            r = x_ref[_sds(rbase, tt, step), :]
            y = (y + r) * scale
        y = jnp.where(valid, y, 0.0)                           # keep time padding at exact zero
        if apply_log:                                          # fused log-compression (last layer)
            y = jnp.log(jnp.abs(y) + 1.0)
        o_ref[...] = y.astype(o_ref.dtype)


# ------------------------------- layer wrapper ------------------------------- #

def _conv_gn_block(act, w_p, g_p, b_p, *, k, stride, step, t_out, t_alloc, tt,
                   num_t, c_in_true, c_out_true, scale, use_residual, apply_log,
                   eps=EPS):
    """One fused conv block.  act: (B, T_in_alloc, C_in_pad) f32, channels-last."""
    B, t_in_alloc, c_in_dim = act.shape
    c_out_pad = w_p.shape[-1]
    use_dot = c_in_dim >= 16

    kernel = functools.partial(
        _conv_gn_kernel, k=k, stride=stride, step=step, t_out=t_out, tt=tt,
        c_in_true=c_in_true, c_out_true=c_out_true, eps=eps, scale=scale,
        use_residual=use_residual, apply_log=apply_log, use_dot=use_dot)

    w_bytes = jnp.dtype(w_p.dtype).itemsize
    # double-buffered input / output / weight blocks + scratch (+ headroom)
    vmem_need = (2 * t_in_alloc * c_in_dim * 4
                 + 2 * tt * c_out_pad * 4
                 + 2 * k * c_in_dim * c_out_pad * w_bytes
                 + 4 * 2 * c_out_pad * 4
                 + t_alloc * c_out_pad * 4
                 + 4 * c_out_pad * 4)
    vmem_limit = int(min(112 << 20, max(vmem_need + (4 << 20), 32 << 20)))

    flops = 2 * B * t_alloc * c_in_dim * c_out_pad * k + 12 * B * t_alloc * c_out_pad
    transcendentals = B * t_alloc * c_out_pad if apply_log else B
    bytes_accessed = (4 * (int(act.size) + B * t_alloc * c_out_pad)
                      + int(w_p.size) * w_bytes)

    return pl.pallas_call(
        kernel,
        out_shape=jax.ShapeDtypeStruct((B, t_alloc, c_out_pad), jnp.float32),
        grid=(B, 2, num_t),
        in_specs=[
            pl.BlockSpec((None, t_in_alloc, c_in_dim), lambda b, p, t: (b, 0, 0)),
            pl.BlockSpec((k, c_in_dim, c_out_pad), lambda b, p, t: (0, 0, 0)),
            pl.BlockSpec((1, c_out_pad), lambda b, p, t: (0, 0)),
            pl.BlockSpec((1, c_out_pad), lambda b, p, t: (0, 0)),
        ],
        out_specs=pl.BlockSpec((None, tt, c_out_pad), lambda b, p, t: (b, t, 0)),
        scratch_shapes=[
            pltpu.VMEM((t_alloc, c_out_pad), jnp.float32),   # pre-norm conv output
            pltpu.VMEM((2, c_out_pad), jnp.float32),         # per-lane [sum; sumsq]
            pltpu.VMEM((1, c_out_pad), jnp.float32),         # GroupNorm mean (broadcast)
            pltpu.VMEM((1, c_out_pad), jnp.float32),         # GroupNorm 1/std (broadcast)
        ],
        compiler_params=pltpu.CompilerParams(
            dimension_semantics=("parallel", "arbitrary", "arbitrary"),
            vmem_limit_bytes=vmem_limit),
        cost_estimate=pl.CostEstimate(
            flops=int(flops), transcendentals=int(transcendentals),
            bytes_accessed=int(bytes_accessed)),
    )(act, w_p, g_p, b_p)


# ----------------------------- full module forward --------------------------- #

def conv_feature_extraction(x, params, conv_cfg, *, log_compression=True,
                            skip_connections=True, residual_scale=0.5,
                            compute_dtype=jnp.float32, max_time_tile=512):
    """x: (B, T) float32 -> (B, C_last, T_last) float32 (PyTorch NCT output layout)."""
    assert max_time_tile % SUBLANE == 0
    B, T = x.shape
    n_layers = len(conv_cfg)
    scale = math.sqrt(residual_scale)

    # ---- static schedule: true lengths, residual steps, tiles, allocations ----
    t_real = [T]
    layers = []
    in_d = 1
    for dim, k, stride in conv_cfg:
        t_out = (t_real[-1] - k) // stride + 1
        use_res = skip_connections and (in_d == dim)
        step = (t_real[-1] // t_out) if use_res else 1
        layers.append(dict(c_in=in_d, c_out=dim, k=k, stride=stride,
                           use_res=use_res, step=step, t_out=t_out))
        t_real.append(t_out)
        in_d = dim

    # Back-to-front: each layer's output allocation already contains the next layer's
    # conv halo / residual taps -> no inter-layer jnp.pad copies.
    tt = [0] * n_layers
    t_alloc = [0] * n_layers
    for li in range(n_layers - 1, -1, -1):
        L = layers[li]
        need = _round_up(L["t_out"], SUBLANE)
        if li + 1 < n_layers:
            nxt = layers[li + 1]
            need = max(need, (t_alloc[li + 1] - 1) * nxt["stride"] + nxt["k"])
            if nxt["use_res"]:
                need = max(need, (t_alloc[li + 1] - 1) * nxt["step"] + 1)
        tt[li] = min(_round_up(need, SUBLANE), max_time_tile)
        t_alloc[li] = _round_up(need, tt[li])

    # ---- layer-0 input: k-tap stack of the waveform -> dense pointwise contraction ----
    L0 = layers[0]
    assert L0["c_in"] == 1
    k0, s0 = L0["k"], L0["stride"]
    need_wave = t_alloc[0] * s0 + k0
    xp = jnp.pad(x.astype(jnp.float32), ((0, 0), (0, need_wave - T)))
    act = jnp.stack([xp[:, j:j + t_alloc[0] * s0:s0] for j in range(k0)], axis=-1)

    for li, ((w, gamma, beta), L) in enumerate(zip(params, layers)):
        c_out = L["c_out"]
        c_out_pad = _round_up(c_out, LANE)
        c_in_dim = act.shape[-1]                       # channels of the staged input

        if li == 0:
            # recast: k_eff=1, stride_eff=1, c_in_eff=k0 over the tap-stacked input
            k_eff, stride_eff, c_in_true = 1, 1, k0
            w_t = jnp.transpose(w, (1, 2, 0))          # (1, k0, C_out)
        else:
            k_eff, stride_eff, c_in_true = L["k"], L["stride"], L["c_in"]
            w_t = jnp.transpose(w, (2, 1, 0))          # (k, C_in, C_out)

        use_dot = c_in_dim >= 16
        w_dtype = compute_dtype if use_dot else jnp.float32
        w_p = jnp.pad(w_t.astype(jnp.float32),
                      ((0, 0), (0, c_in_dim - w_t.shape[1]),
                       (0, c_out_pad - c_out))).astype(w_dtype)
        g_p = jnp.pad(gamma.astype(jnp.float32),
                      (0, c_out_pad - c_out)).reshape(1, c_out_pad)
        b_p = jnp.pad(beta.astype(jnp.float32),
                      (0, c_out_pad - c_out)).reshape(1, c_out_pad)

        act = _conv_gn_block(
            act, w_p, g_p, b_p,
            k=k_eff, stride=stride_eff, step=L["step"], t_out=L["t_out"],
            t_alloc=t_alloc[li], tt=tt[li], num_t=t_alloc[li] // tt[li],
            c_in_true=c_in_true, c_out_true=c_out, scale=scale,
            use_residual=L["use_res"],
            apply_log=log_compression and (li == n_layers - 1))

    # drop padding once, single NCT transpose at the very end
    out = act[:, :t_real[-1], :layers[-1]["c_out"]]
    return jnp.transpose(out, (0, 2, 1))


# -------------------------------- JAX reference ------------------------------ #

def reference_forward(x, params, conv_cfg, *, log_compression=True,
                      skip_connections=True, residual_scale=0.5):
    scale = math.sqrt(residual_scale)
    y = x[:, None, :].astype(jnp.float32)                 # (B, 1, T)
    for (w, gamma, beta), (dim, k, stride) in zip(params, conv_cfg):
        residual = y
        y = jax.lax.conv_general_dilated(
            y, w, window_strides=(stride,), padding="VALID",
            dimension_numbers=("NCH", "OIH", "NCH"))
        mean = y.mean(axis=(1, 2), keepdims=True)
        var = jnp.square(y - mean).mean(axis=(1, 2), keepdims=True)
        y = (y - mean) / jnp.sqrt(var + EPS)
        y = y * gamma[None, :, None] + beta[None, :, None]
        y = jnp.maximum(y, 0.0)
        if skip_connections and y.shape[1] == residual.shape[1]:
            tsz, r_tsz = y.shape[2], residual.shape[2]
            residual = residual[..., ::r_tsz // tsz][..., :tsz]
            y = (y + residual) * scale
    if log_compression:
        y = jnp.log(jnp.abs(y) + 1.0)
    return y


# ------------------------------------ main ----------------------------------- #

if __name__ == "__main__":
    key = jax.random.PRNGKey(0)

    conv_cfg = [(32, 3, 2), (32, 3, 2), (32, 2, 1)]       # (dim, kernel, stride)
    B, T = 2, 128

    key, kx = jax.random.split(key)
    x = jax.random.normal(kx, (B, T), dtype=jnp.float32)

    params = []
    in_d = 1
    for dim, k, stride in conv_cfg:
        key, kw, kg, kb = jax.random.split(key, 4)
        w = jax.random.normal(kw, (dim, in_d, k), dtype=jnp.float32) / math.sqrt(in_d * k)
        gamma = 1.0 + 0.1 * jax.random.normal(kg, (dim,), dtype=jnp.float32)
        beta = 0.1 * jax.random.normal(kb, (dim,), dtype=jnp.float32)
        params.append((w, gamma, beta))
        in_d = dim

    ref = jax.block_until_ready(reference_forward(
        x, params, conv_cfg, log_compression=True, skip_connections=True,
        residual_scale=0.5))

    # f32 operands (accuracy check).  max_time_tile=64 forces the multi-tile /
    # two-phase path to be exercised even at these toy sequence lengths.
    out = jax.block_until_ready(conv_feature_extraction(
        x, params, conv_cfg, log_compression=True, skip_connections=True,
        residual_scale=0.5, compute_dtype=jnp.float32, max_time_tile=64))
    assert out.shape == ref.shape, (out.shape, ref.shape)
    max_err = float(jnp.max(jnp.abs(out - ref)))
    assert jnp.allclose(out, ref, atol=2e-3, rtol=2e-3), max_err

    # bf16 matmul operands (v6e/v7x MXU fast path): f32 accumulation / stats / epilogue.
    # Loose tolerance covers bf16 operand rounding across two matmul layers.
    out_bf16 = jax.block_until_ready(conv_feature_extraction(
        x, params, conv_cfg, log_compression=True, skip_connections=True,
        residual_scale=0.5, compute_dtype=jnp.bfloat16))
    max_err_bf16 = float(jnp.max(jnp.abs(out_bf16 - ref)))
    assert jnp.allclose(out_bf16, ref, atol=5e-2, rtol=5e-2), max_err_bf16

    print("KERNEL_OK")
</pallas_src>

<mosaic_0001>
module attributes {stable_mosaic.version = 11 : i64} {
  func.func @_conv_gn_kernel(%arg0: i32, %arg1: i32, %arg2: i32, %arg3: memref<1x128x3xf32, #tpu.memory_space<vmem>>, %arg4: memref<1x3x128xf32, #tpu.memory_space<vmem>>, %arg5: memref<1x128xf32, #tpu.memory_space<vmem>>, %arg6: memref<1x128xf32, #tpu.memory_space<vmem>>, %arg7: memref<1x64x128xf32, #tpu.memory_space<vmem>>, %arg8: memref<128x128xf32, #tpu.memory_space<vmem>>, %arg9: memref<2x128xf32, #tpu.memory_space<vmem>>, %arg10: memref<1x128xf32, #tpu.memory_space<vmem>>, %arg11: memref<1x128xf32, #tpu.memory_space<vmem>>) attributes {dimension_semantics = [#tpu.dimension_semantics<parallel>, #tpu.dimension_semantics<arbitrary>, #tpu.dimension_semantics<arbitrary>], iteration_bounds = array<i64: 2, 2, 2>, scalar_prefetch = 0 : i64, scratch_operands = 4 : i64, tpu.core_type = #tpu.core_type<tc>, window_params = [{transform_indices = @transform_0, window_bounds = array<i64: 1, 128, 3>}, {pipeline_mode = #tpu.pipeline_mode<synchronous>, transform_indices = @transform_1, window_bounds = array<i64: 1, 3, 128>}, {pipeline_mode = #tpu.pipeline_mode<synchronous>, transform_indices = @transform_2, window_bounds = array<i64: 1, 128>}, {pipeline_mode = #tpu.pipeline_mode<synchronous>, transform_indices = @transform_3, window_bounds = array<i64: 1, 128>}, {transform_indices = @transform_4, window_bounds = array<i64: 1, 64, 128>}]} {
    %c64_i32 = arith.constant 64 : i32
    %0 = arith.muli %arg2, %c64_i32 : i32
    %1 = tpu.assume_multiple %0, 8 : i32
    %2 = tpu.iota {dimensions = array<i32: 0>} : vector<64x1xi32>
    %3 = vector.broadcast %1 : i32 to vector<64x1xi32>
    %4 = arith.addi %3, %2 : vector<64x1xi32>
    %c63_i32 = arith.constant 63 : i32
    %5 = vector.broadcast %c63_i32 : i32 to vector<64x1xi32>
    %6 = arith.cmpi slt, %4, %5 : vector<64x1xi32>
    %c0_i32 = arith.constant 0 : i32
    %7 = arith.cmpi eq, %arg1, %c0_i32 : i32
    %c0_i32_0 = arith.constant 0 : i32
    %8 = arith.cmpi eq, %arg2, %c0_i32_0 : i32
    %9 = arith.andi %7, %8 : i1
    %10 = arith.extui %9 : i1 to i32
    %c0_i32_1 = arith.constant 0 : i32
    %11 = arith.cmpi ne, %10, %c0_i32_1 : i32
    scf.if %11 {
      %cst = arith.constant 0.000000e+00 : f32
      %23 = vector.broadcast %cst : f32 to vector<2x128xf32>
      %c0 = arith.constant 0 : index
      %c0_8 = arith.constant 0 : index
      %24 = vector.load %arg9[%c0, %c0_8] : memref<2x128xf32, #tpu.memory_space<vmem>>, vector<2x128xf32>
      tpu.vector_store %arg9[%c0, %c0_8], %23 {strides = array<i32>} : memref<2x128xf32, #tpu.memory_space<vmem>>, vector<2x128xf32>,
    } else {
    }
    %c0_i32_2 = arith.constant 0 : i32
    %12 = arith.cmpi eq, %arg1, %c0_i32_2 : i32
    %13 = arith.extui %12 : i1 to i32
    %c0_i32_3 = arith.constant 0 : i32
    %14 = arith.cmpi ne, %13, %c0_i32_3 : i32
    scf.if %14 {
      %c64_i32_8 = arith.constant 64 : i32
      %23 = arith.muli %arg2, %c64_i32_8 : i32
      %24 = tpu.assume_multiple %23, 8 : i32
      %cst = arith.constant 0.000000e+00 : f32
      %25 = vector.broadcast %cst : f32 to vector<64x128xf32>
      %c0_i32_9 = arith.constant 0 : i32
      %26 = arith.addi %24, %c0_i32_9 : i32
      %c0 = arith.constant 0 : index
      %27 = arith.index_cast %26 : i32 to index
      %c0_10 = arith.constant 0 : index
      %28 = vector.load %arg3[%c0, %27, %c0_10] : memref<1x128x3xf32, #tpu.memory_space<vmem>>, vector<1x64x3xf32>
      %29 = vector.shape_cast %28 : vector<1x64x3xf32> to vector<64x3xf32>
      %c0_11 = arith.constant 0 : index
      %c0_12 = arith.constant 0 : index
      %c0_13 = arith.constant 0 : index
      %30 = vector.load %arg4[%c0_11, %c0_12, %c0_13] : memref<1x3x128xf32, #tpu.memory_space<vmem>>, vector<1x3x128xf32>
      %31 = vector.shape_cast %30 : vector<1x3x128xf32> to vector<3x128xf32>
      %32 = vector.extract_strided_slice %29 {offsets = [0, 0], sizes = [64, 1], strides = [1, 1]} : vector<64x3xf32> to vector<64x1xf32>
      %33 = vector.extract_strided_slice %31 {offsets = [0, 0], sizes = [1, 128], strides = [1, 1]} : vector<3x128xf32> to vector<1x128xf32>
      %34 = vector.broadcast %32 : vector<64x1xf32> to vector<64x128xf32>
      %35 = vector.broadcast %33 : vector<1x128xf32> to vector<64x128xf32>
      %36 = arith.mulf %34, %35 : vector<64x128xf32>
      %37 = arith.addf %25, %36 : vector<64x128xf32>
      %38 = vector.extract_strided_slice %29 {offsets = [0, 1], sizes = [64, 1], strides = [1, 1]} : vector<64x3xf32> to vector<64x1xf32>
      %39 = vector.extract_strided_slice %31 {offsets = [1, 0], sizes = [1, 128], strides = [1, 1]} : vector<3x128xf32> to vector<1x128xf32>
      %40 = vector.broadcast %38 : vector<64x1xf32> to vector<64x128xf32>
      %41 = vector.broadcast %39 : vector<1x128xf32> to vector<64x128xf32>
      %42 = arith.mulf %40, %41 : vector<64x128xf32>
      %43 = arith.addf %37, %42 : vector<64x128xf32>
      %44 = vector.extract_strided_slice %29 {offsets = [0, 2], sizes = [64, 1], strides = [1, 1]} : vector<64x3xf32> to vector<64x1xf32>
      %45 = vector.extract_strided_slice %31 {offsets = [2, 0], sizes = [1, 128], strides = [1, 1]} : vector<3x128xf32> to vector<1x128xf32>
      %46 = vector.broadcast %44 : vector<64x1xf32> to vector<64x128xf32>
      %47 = vector.broadcast %45 : vector<1x128xf32> to vector<64x128xf32>
      %48 = arith.mulf %46, %47 : vector<64x128xf32>
      %49 = arith.addf %43, %48 : vector<64x128xf32>
      %cst_14 = arith.constant 0.000000e+00 : f32
      %50 = vector.shape_cast %6 : vector<64x1xi1> to vector<64x1xi1>
      %51 = vector.broadcast %50 : vector<64x1xi1> to vector<64x128xi1>
      %52 = vector.broadcast %cst_14 : f32 to vector<64x128xf32>
      %53 = arith.select %51, %49, %52 : vector<64x128xi1>, vector<64x128xf32>
      %54 = arith.index_cast %1 : i32 to index
      %c0_15 = arith.constant 0 : index
      %55 = vector.load %arg8[%54, %c0_15] : memref<128x128xf32, #tpu.memory_space<vmem>>, vector<64x128xf32>
      tpu.vector_store %arg8[%54, %c0_15], %53 {strides = array<i32>} : memref<128x128xf32, #tpu.memory_space<vmem>>, vector<64x128xf32>,
      %c0_16 = arith.constant 0 : index
      %c0_17 = arith.constant 0 : index
      %56 = vector.load %arg9[%c0_16, %c0_17] : memref<2x128xf32, #tpu.memory_space<vmem>>, vector<1x128xf32>
      %cst_18 = arith.constant dense<0.000000e+00> : vector<128xf32>
      %57 = vector.multi_reduction <add>, %53, %cst_18 [0] : vector<64x128xf32> to vector<128xf32>
      %58 = vector.shape_cast %57 : vector<128xf32> to vector<1x128xf32>
      %59 = arith.addf %56, %58 : vector<1x128xf32>
      %c0_19 = arith.constant 0 : index
      %c0_20 = arith.constant 0 : index
      %60 = vector.load %arg9[%c0_19, %c0_20] : memref<2x128xf32, #tpu.memory_space<vmem>>, vector<1x128xf32>
      tpu.vector_store %arg9[%c0_19, %c0_20], %59 {strides = array<i32>} : memref<2x128xf32, #tpu.memory_space<vmem>>, vector<1x128xf32>,
      %c1 = arith.constant 1 : index
      %c0_21 = arith.constant 0 : index
      %61 = vector.load %arg9[%c1, %c0_21] : memref<2x128xf32, #tpu.memory_space<vmem>>, vector<1x128xf32>
      %62 = arith.mulf %53, %53 : vector<64x128xf32>
      %cst_22 = arith.constant dense<0.000000e+00> : vector<128xf32>
      %63 = vector.multi_reduction <add>, %62, %cst_22 [0] : vector<64x128xf32> to vector<128xf32>
      %64 = vector.shape_cast %63 : vector<128xf32> to vector<1x128xf32>
      %65 = arith.addf %61, %64 : vector<1x128xf32>
      %c1_23 = arith.constant 1 : index
      %c0_24 = arith.constant 0 : index
      %66 = vector.load %arg9[%c1_23, %c0_24] : memref<2x128xf32, #tpu.memory_space<vmem>>, vector<1x128xf32>
      tpu.vector_store %arg9[%c1_23, %c0_24], %65 {strides = array<i32>} : memref<2x128xf32, #tpu.memory_space<vmem>>, vector<1x128xf32>,
    } else {
    }
    %c1_i32 = arith.constant 1 : i32
    %15 = arith.cmpi eq, %arg1, %c1_i32 : i32
    %c0_i32_4 = arith.constant 0 : i32
    %16 = arith.cmpi eq, %arg2, %c0_i32_4 : i32
    %17 = arith.andi %15, %16 : i1
    %18 = arith.extui %17 : i1 to i32
    %c0_i32_5 = arith.constant 0 : i32
    %19 = arith.cmpi ne, %18, %c0_i32_5 : i32
    scf.if %19 {
      %c0 = arith.constant 0 : index
      %c0_8 = arith.constant 0 : index
      %23 = vector.load %arg9[%c0, %c0_8] : memref<2x128xf32, #tpu.memory_space<vmem>>, vector<1x128xf32>
      %24 = vector.shape_cast %23 : vector<1x128xf32> to vector<1x1x128xf32>
      %cst = arith.constant dense<0.000000e+00> : vector<1xf32>
      %25 = vector.multi_reduction <add>, %24, %cst [1, 2] : vector<1x1x128xf32> to vector<1xf32>
      %26 = vector.shape_cast %25 : vector<1xf32> to vector<1x1x1xf32>
      %27 = vector.extract %26[0, 0, 0] : f32 from vector<1x1x1xf32>
      %cst_9 = arith.constant 2.016000e+03 : f32
      %28 = arith.divf %27, %cst_9 : f32
      %c1 = arith.constant 1 : index
      %c0_10 = arith.constant 0 : index
      %29 = vector.load %arg9[%c1, %c0_10] : memref<2x128xf32, #tpu.memory_space<vmem>>, vector<1x128xf32>
      %30 = vector.shape_cast %29 : vector<1x128xf32> to vector<1x1x128xf32>
      %cst_11 = arith.constant dense<0.000000e+00> : vector<1xf32>
      %31 = vector.multi_reduction <add>, %30, %cst_11 [1, 2] : vector<1x1x128xf32> to vector<1xf32>
      %32 = vector.shape_cast %31 : vector<1xf32> to vector<1x1x1xf32>
      %33 = vector.extract %32[0, 0, 0] : f32 from vector<1x1x1xf32>
      %cst_12 = arith.constant 2.016000e+03 : f32
      %34 = arith.divf %33, %cst_12 : f32
      %35 = arith.mulf %28, %28 : f32
      %36 = arith.subf %34, %35 : f32
      %cst_13 = arith.constant 0.000000e+00 : f32
      %37 = arith.maximumf %36, %cst_13 : f32
      %38 = vector.broadcast %28 : f32 to vector<1x128xf32>
      %c0_14 = arith.constant 0 : index
      %c0_15 = arith.constant 0 : index
      %39 = vector.load %arg10[%c0_14, %c0_15] : memref<1x128xf32, #tpu.memory_space<vmem>>, vector<1x128xf32>
      tpu.vector_store %arg10[%c0_14, %c0_15], %38 {strides = array<i32>} : memref<1x128xf32, #tpu.memory_space<vmem>>, vector<1x128xf32>,
      %cst_16 = arith.constant 9.99999974E-6 : f32
      %40 = arith.addf %37, %cst_16 : f32
      %41 = math.rsqrt %40 : f32
      %42 = vector.broadcast %41 : f32 to vector<1x128xf32>
      %c0_17 = arith.constant 0 : index
      %c0_18 = arith.constant 0 : index
      %43 = vector.load %arg11[%c0_17, %c0_18] : memref<1x128xf32, #tpu.memory_space<vmem>>, vector<1x128xf32>
      tpu.vector_store %arg11[%c0_17, %c0_18], %42 {strides = array<i32>} : memref<1x128xf32, #tpu.memory_space<vmem>>, vector<1x128xf32>,
    } else {
    }
    %c1_i32_6 = arith.constant 1 : i32
    %20 = arith.cmpi eq, %arg1, %c1_i32_6 : i32
    %21 = arith.extui %20 : i1 to i32
    %c0_i32_7 = arith.constant 0 : i32
    %22 = arith.cmpi ne, %21, %c0_i32_7 : i32
    scf.if %22 {
      %23 = arith.index_cast %1 : i32 to index
      %c0 = arith.constant 0 : index
      %24 = vector.load %arg8[%23, %c0] : memref<128x128xf32, #tpu.memory_space<vmem>>, vector<64x128xf32>
      %c0_8 = arith.constant 0 : index
      %c0_9 = arith.constant 0 : index
      %25 = vector.load %arg10[%c0_8, %c0_9] : memref<1x128xf32, #tpu.memory_space<vmem>>, vector<1x128xf32>
      %26 = vector.broadcast %25 : vector<1x128xf32> to vector<64x128xf32>
      %27 = arith.subf %24, %26 : vector<64x128xf32>
      %c0_10 = arith.constant 0 : index
      %c0_11 = arith.constant 0 : index
      %28 = vector.load %arg11[%c0_10, %c0_11] : memref<1x128xf32, #tpu.memory_space<vmem>>, vector<1x128xf32>
      %29 = vector.broadcast %28 : vector<1x128xf32> to vector<64x128xf32>
      %30 = arith.mulf %27, %29 : vector<64x128xf32>
      %c0_12 = arith.constant 0 : index
      %c0_13 = arith.constant 0 : index
      %31 = vector.load %arg5[%c0_12, %c0_13] : memref<1x128xf32, #tpu.memory_space<vmem>>, vector<1x128xf32>
      %32 = vector.broadcast %31 : vector<1x128xf32> to vector<64x128xf32>
      %33 = arith.mulf %30, %32 : vector<64x128xf32>
      %c0_14 = arith.constant 0 : index
      %c0_15 = arith.constant 0 : index
      %34 = vector.load %arg6[%c0_14, %c0_15] : memref<1x128xf32, #tpu.memory_space<vmem>>, vector<1x128xf32>
      %35 = vector.broadcast %34 : vector<1x128xf32> to vector<64x128xf32>
      %36 = arith.addf %33, %35 : vector<64x128xf32>
      %cst = arith.constant 0.000000e+00 : f32
      %37 = vector.broadcast %cst : f32 to vector<64x128xf32>
      %38 = arith.maximumf %36, %37 : vector<64x128xf32>
      %cst_16 = arith.constant 0.000000e+00 : f32
      %39 = vector.shape_cast %6 : vector<64x1xi1> to vector<64x1xi1>
      %40 = vector.broadcast %39 : vector<64x1xi1> to vector<64x128xi1>
      %41 = vector.broadcast %cst_16 : f32 to vector<64x128xf32>
      %42 = arith.select %40, %38, %41 : vector<64x128xi1>, vector<64x128xf32>
      %c0_17 = arith.constant 0 : index
      %c0_18 = arith.constant 0 : index
      %c0_19 = arith.constant 0 : index
      %43 = vector.load %arg7[%c0_17, %c0_18, %c0_19] : memref<1x64x128xf32, #tpu.memory_space<vmem>>, vector<1x64x128xf32>
      %44 = vector.shape_cast %43 : vector<1x64x128xf32> to vector<64x128xf32>
      %45 = vector.shape_cast %42 : vector<64x128xf32> to vector<1x64x128xf32>
      tpu.vector_store %arg7[%c0_17, %c0_18, %c0_19], %45 {strides = array<i32>} : memref<1x64x128xf32, #tpu.memory_space<vmem>>, vector<1x64x128xf32>,
    } else {
    }
    return
  }
  func.func @transform_0(%arg0: i32, %arg1: i32, %arg2: i32) -> (i32, i32, i32) {
    %c0_i32 = arith.constant 0 : i32
    %c0_i32_0 = arith.constant 0 : i32
    %c0_i32_1 = arith.constant 0 : i32
    return %arg0, %c0_i32, %c0_i32_0 : i32, i32, i32
  }
  func.func @transform_1(%arg0: i32, %arg1: i32, %arg2: i32) -> (i32, i32, i32) {
    %c0_i32 = arith.constant 0 : i32
    %c0_i32_0 = arith.constant 0 : i32
    %c0_i32_1 = arith.constant 0 : i32
    %c0_i32_2 = arith.constant 0 : i32
    return %c0_i32, %c0_i32_0, %c0_i32_1 : i32, i32, i32
  }
  func.func @transform_2(%arg0: i32, %arg1: i32, %arg2: i32) -> (i32, i32) {
    %c0_i32 = arith.constant 0 : i32
    %c0_i32_0 = arith.constant 0 : i32
    %c0_i32_1 = arith.constant 0 : i32
    return %c0_i32, %c0_i32_0 : i32, i32
  }
  func.func @transform_3(%arg0: i32, %arg1: i32, %arg2: i32) -> (i32, i32) {
    %c0_i32 = arith.constant 0 : i32
    %c0_i32_0 = arith.constant 0 : i32
    %c0_i32_1 = arith.constant 0 : i32
    return %c0_i32, %c0_i32_0 : i32, i32
  }
  func.func @transform_4(%arg0: i32, %arg1: i32, %arg2: i32) -> (i32, i32, i32) {
    %c0_i32 = arith.constant 0 : i32
    %c0_i32_0 = arith.constant 0 : i32
    return %arg0, %arg2, %c0_i32 : i32, i32, i32
  }
}

</mosaic_0001>

<bundles_post_ra>
// kernel: tpu_custom_call.1
= control target key start
LH: loop header
LB: loop body
LE: loop exit
PB: predicated region body
PF: predicated region fallthrough
CT: control target
= control target key end

     0   :  { %s1341_s0 = inlined_call_operand.vmem [shape: f32[2,128,3], index: 0, kind: input, shape index: {}]   ;;  %s1342_s1 = inlined_call_operand.vmem [shape: f32[1,3,128], index: 1, kind: input, shape index: {}]   ;;  %s1343_s2 = inlined_call_operand.vmem [shape: f32[1,128], index: 2, kind: input, shape index: {}]   ;;  %s1344_s3 = inlined_call_operand.vmem [shape: f32[1,128], index: 3, kind: input, shape index: {}]   ;;  %s1345_s4 = inlined_call_operand.hbm [shape: f32[2,128,128], index: 4, kind: output, shape index: {}]  }
   0x1   :  { %1347 = sst [smem:[#allocation9_spill]] %s1341_s0 }
   0x2   :  { %1348 = sst [smem:[#allocation10_spill]] %s1342_s1 }
   0x3   :  { %1349 = sst [smem:[#allocation11_spill]] %s1343_s2 }
   0x4   :  { %9 = vsyncpa [#allocation7], 0 }
   0x5   :  { %11 = vsyncpa [#allocation7 + $0x1], 0  ;;  %s1054_s15 = smov 0   ;;  %s1056_s16 = smov 0  }
   0x6   :  { %s1058_s17 = smov 0   ;;  %s1060_s18 = smov 0  }
   0x7   :  { %s1062_s19 = smov 0   ;;  %s1064_s20 = smov 0  }
   0x8   :  { %s1066_s21 = smov 0   ;;  %s1068_s22 = smov 0  }
   0x9   :  { %s1070_s23 = smov 0   ;;  %s1072_s24 = smov 0  }
   0xa LB: > { %s765_s25 = sadd.s32 4294967295, %s1019_s24   ;;  %s29_s26 = sadd.s32 1, %s1007_s21  ;;  %s1019_s24 = sphi %s1072_s24, %s17_s24   ;;  %s1015_s23 = sphi %s1070_s23, %s1364_s23   ;;  %s1011_s22 = sphi %s1068_s22, %s1363_s22   ;;  %s1007_s21 = sphi %s1066_s21, %s1362_s21   ;;  %s1003_s20 = sphi %s1064_s20, %s1361_s20   ;;  %s999_s19 = sphi %s1062_s19, %s1360_s19   ;;  %s995_s18 = sphi %s1060_s18, %s1359_s18   ;;  %s991_s17 = sphi %s1058_s17, %s1358_s17   ;;  %s987_s16 = sphi %s1056_s16, %s1357_s16   ;;  %s983_s15 = sphi %s1054_s15, %s1356_s15  }
   0xb   : > { %p30_p0 = scmp.ge.s32.totalorder %s29_s26, 2  ;;  %s32_s27 = sadd.s32 1, %s1011_s22 }
   0xc   : > { %s766_s28 = sadd.s32 4294967294, %s1019_s24   ;;  %p144_p1 = scmp.ne.s32.totalorder %s991_s17, %s987_s16 }
   0xd   : > { %s1366_s26 = smov (%p30_p0, %s29_s26), 0  ;;  %s1368_s27 = smov (!%p30_p0, %s32_s27), %s1011_s22 }
   0xe   : > { %s36_s29 = sadd.s32 1, %s1015_s23  ;;  %p145_p2 = scmp.eq.s32.totalorder %s765_s25, 7 }
   0xf   : > { %p34_p3 = scmp.ge.s32.totalorder %s1368_s27, 2  ;;  %p150_p4 = scmp.ne.s32.totalorder %s987_s16, %s983_s15 }
  0x10   : > { %p1116_p5 = por %p145_p2, %p144_p1  ;;  %p151_p6 = scmp.eq.s32.totalorder %s766_s28, 7 }
  0x11   : > { %s1370_s27 = smov (%p34_p3, %s1368_s27), 0  ;;  %s1372_s29 = smov (!%p34_p3, %s36_s29), %s1015_s23 }
  0x12   : > { %p1123_p7 = por %p151_p6, %p150_p4  ;;  %p769_p8 = scmp.ge.s32.totalorder %s1019_s24, 1 }
  0x13   : > { %p38_p9 = scmp.ge.s32.totalorder %s1372_s29, 2  ;;  %p186_p10 = scmp.lt.s32.totalorder %s1019_s24, 9 }
  0x14   : > { %s130_s6 = ssub.s32 %s1007_s21, %s1366_s26  ;;  %s134_s9 = sadd.s32 1, %s991_s17 }
  0x15   : > { %s1374_s29 = smov (%p38_p9, %s1372_s29), 0  ;;  %p187_p11 = pnand %p769_p8, %p186_p10 }
  0x16   : > { %s129_s7 = ssub.s32 %s1015_s23, %s1374_s29  ;;  %s1346_s11 = sand.u32 (!%p187_p11), 1, %s987_s16  }
  0x17   : > { %s131_s8 = sor.u32 %s130_s6, %s129_s7  ;;  %190 = sbr.rel (%p187_p11) target bundleno = 581 (0x245), region = 36 }
  0x18   : > { %p132_p12 = scmp.eq.s32.totalorder %s131_s8, 0  ;;  %p212_p13 = scmp.lt.s32.totalorder (!%p187_p11), %s1003_s20, 1 }
  0x19   : > { %s1143_s12 = sshll.u32 (!%p187_p11), %s1346_s11, 6  ;;  %s1146_s13 = sshll.u32 (!%p187_p11), %s995_s18, 6 }
  0x1a   : > { %s1137_s10 = scalar_select %p132_p12, %s991_s17, %s134_s9  }
  0x1b   : > { %p245_p0 = scmp.eq.s32.totalorder (!%p187_p11), %s999_s19, 0  ;;  %p246_p1 = scmp.eq.s32.totalorder (!%p187_p11), %s995_s18, 0 }
  0x1c   : > { %v219_v0 = vlaneseq  ;;  %v228_v2 = vstv %s1146_s13  ;;  %s213_s14 = scalar_select %p212_p13, %s1003_s20, 1 }
  0x1d   : > { %s1352_s0 = sld [smem:[#allocation9_spill]]  ;;  %p247_p2 = pnand %p246_p1, %p245_p0 }
  0x1e   : > { %v220_v1 = vshrl.u32 %v219_v0, 7  ;;  %s782_s25 = sshll.u32 %s213_s14, 7  ;;  %s1184_s8 = scalar_lea.vmem [#allocation6], %s1143_s12 }
  0x20   : > { %v221_v3 = vadd.s32 8, %v220_v1  ;;  %v222_v4 = vadd.s32 16, %v220_v1  ;;  %v223_v5 = vadd.s32 24, %v220_v1  ;;  %v224_v6 = vadd.s32 32, %v220_v1 }
  0x21   : > { %v225_v7 = vadd.s32 40, %v220_v1  ;;  %v226_v8 = vadd.s32 48, %v220_v1  ;;  %v227_v9 = vadd.s32 56, %v220_v1  ;;  %v1152_v10 = vadd.s32 %v228_v2, %v220_v1  ;;  %250 = sbr.rel (%p247_p2) target bundleno = 40 (0x28), region = 40 }
  0x22   : > { %v1157_v11 = vadd.s32 %v228_v2, %v221_v3  ;;  %v1159_v12 = vadd.s32 %v228_v2, %v222_v4  ;;  %v1161_v13 = vadd.s32 %v228_v2, %v223_v5  ;;  %v1163_v14 = vadd.s32 %v228_v2, %v224_v6 }
  0x23   : > { %s216_s7 = scalar_lea.vmem %s1352_s0, %s782_s25  ;;  %v1169_v15 = vadd.s32 %v228_v2, %v225_v7  ;;  %v1171_v16 = vadd.s32 %v228_v2, %v226_v8  ;;  %v1173_v17 = vadd.s32 %v228_v2, %v227_v9  ;;  %vm237_vm0 = vcmp.lt.s32.totalorder %v1152_v10, 63 }
  0x24   : > { %vm238_vm1 = vcmp.lt.s32.totalorder %v1157_v11, 63  ;;  %vm239_vm2 = vcmp.lt.s32.totalorder %v1159_v12, 63  ;;  %vm240_vm3 = vcmp.lt.s32.totalorder %v1161_v13, 63  ;;  %vm241_vm4 = vcmp.lt.s32.totalorder %v1163_v14, 63 }
  0x25   : > { %vm242_vm5 = vcmp.lt.s32.totalorder %v1169_v15, 63  ;;  %vm243_vm6 = vcmp.lt.s32.totalorder %v1171_v16, 63  ;;  %vm244_vm7 = vcmp.lt.s32.totalorder %v1173_v17, 63 }
  0x26   : > { %v1021_v18 = vmov 0.0  }
  0x27   : > { %251 = vst [vmem:[#allocation3] sm:$0x3] %v1021_v18 }
  0x28 PF: > { %p774_p3 = scmp.ne.s32.totalorder %s999_s19, 0 }
  0x29   : > { %s255_s9 = scalar_lea.vmem (!%p774_p3), %s216_s7, %s1146_s13  ;;  %s1353_s1 = sld [smem:[#allocation10_spill]] (!%p774_p3) }
  0x2a   : > { %254 = sbr.rel (%p774_p3) target bundleno = 260 (0x104), region = 44  ;;  %s1207_s25 = scalar_lea.vmem (!%p774_p3), [#allocation2], %s1146_s13 }
  0x2f   : > { %v1022_v19 = vmov 0   ;;  %v260_v20 = vld [vmem:[%s255_s9 + $0x20] sm:$0xff]  ;;  %v258_v21 = vld [vmem:[%s255_s9 + $0x10] sm:$0xff]  ;;  %v261_v23 = vld [vmem:[%s255_s9 + $0x28] sm:$0xff]  ;;  %v1023_v28 = vmov 1   ;;  %v1024_v29 = vmov 2  }
  0x30   : > { %888 = vset.pattern.permute.xlu2 %v1022_v19  ;;  %887 = vset.pattern.permute.xlu1 %v1022_v19  ;;  %v256_v22 = vld [vmem:[%s255_s9] sm:$0xff]  ;;  %v259_v24 = vld [vmem:[%s255_s9 + $0x18] sm:$0xff]  ;;  %v257_v25 = vld [vmem:[%s255_s9 + $0x8] sm:$0xff] }
  0x31   : > { %886 = vset.pattern.permute.xlu0 %v1022_v19  ;;  %287 = vperm.xlu2 %888, %v260_v20   ;;  %v263_v26 = vld [vmem:[%s255_s9 + $0x38] sm:$0xff]  ;;  %v262_v27 = vld [vmem:[%s255_s9 + $0x30] sm:$0xff]  ;;  %v264_v38 = vld [vmem:[%s1353_s1] sm:$0x7] }
  0x32   : > { %277 = vperm.xlu1 %887, %v258_v21   ;;  %267 = vperm.xlu0 %886, %v256_v22   ;;  %v1193_v40 = vperm.slane %v264_v38, 1  ;;  %v1195_v41 = vperm.slane %v264_v38, 0  ;;  %v1199_v44 = vperm.slane %v264_v38, 2 }
  0x39   : > { %292 = vperm.xlu2 %888, %v261_v23  }
  0x3a   : > { %282 = vperm.xlu1 %887, %v259_v24   ;;  %272 = vperm.xlu0 %886, %v257_v25  }
  0x41   : > { %889 = vset.pattern.permute.xlu2 %v1023_v28 }
  0x42   : > { %302 = vperm.xlu1 %887, %v263_v26   ;;  %297 = vperm.xlu0 %886, %v262_v27  }
  0x43   : > { %323 = vperm.xlu2 %889, %v256_v22  }
  0x4a   : > { %891 = vset.pattern.permute.xlu1 %v1023_v28  ;;  %890 = vset.pattern.permute.xlu0 %v1023_v28 }
  0x4b   : > { %331 = vperm.xlu1 %891, %v258_v21   ;;  %335 = vperm.xlu2 %889, %v259_v24  }
  0x4c   : > { %327 = vperm.xlu0 %890, %v257_v25  }
  0x53   : > { %892 = vset.pattern.permute.xlu1 %v1024_v29  ;;  %893 = vset.pattern.permute.xlu2 %v1024_v29 }
  0x54   : > { %894 = vset.pattern.permute.xlu0 %v1024_v29  ;;  %372 = vperm.xlu1 %892, %v256_v22  }
  0x55   : > { %376 = vperm.xlu2 %893, %v257_v25   ;;  %380 = vperm.xlu0 %894, %v258_v21  }
  0x5c   : > { %895 = vset.pattern.permute.xlu1 %v1023_v28 }
  0x5d   : > { %384 = vperm.xlu2 %893, %v259_v24   ;;  %896 = vset.pattern.permute.xlu0 %v1023_v28 }
  0x5e   : > { %339 = vperm.xlu1 %895, %v260_v20   ;;  %347 = vperm.xlu0 %896, %v262_v27  }
  0x65   : > { %388 = vperm.xlu2 %893, %v260_v20  }
  0x66   : > { %343 = vperm.xlu1 %895, %v261_v23   ;;  %900 = vset.pattern.permute.xlu0 %v1024_v29 }
  0x6d   : > { %898 = vset.pattern.permute.xlu2 %v1023_v28 }
  0x6e   : > { %897 = vset.pattern.permute.xlu1 %v1024_v29  ;;  %351 = vperm.xlu2 %898, %v263_v26  }
  0x6f   : > { %392 = vperm.xlu1 %897, %v261_v23  }
  0x76   : > { %899 = vset.pattern.permute.xlu2 %v1024_v29 }
  0x77   : > { %396 = vperm.xlu1 %897, %v262_v27   ;;  %400 = vperm.xlu2 %899, %v263_v26  }
  0x8b   : > { %v288_v30 = vpop.permute.xlu2 %287 }
  0x8c   : > { %v310_v23 = vmul.f32 %v1195_v41, %v288_v30 }
  0x93   : > { %v1188_v31 = vpop.permute.xlu2 %292 }
  0x9d   : > { %v324_v32 = vpop.permute.xlu2 %323 }
  0x9e   : > { %v355_v59 = vmul.f32 %v1193_v40, %v324_v32 }
  0xa4   : > { %v278_v33 = vpop.permute.xlu1 %277  ;;  %v268_v34 = vpop.permute.xlu0 %267 }
  0xa5   : > { %v336_v35 = vpop.permute.xlu2 %335  ;;  %v306_v60 = vmul.f32 %v1195_v41, %v268_v34  ;;  %v308_v0 = vmul.f32 %v1195_v41, %v278_v33 }
  0xa6   : > { %v358_v42 = vmul.f32 %v1193_v40, %v336_v35 }
  0xa7   : > { %v363_v2 = vadd.f32 %v355_v59, %v306_v60 }
  0xac   : > { %v283_v36 = vpop.permute.xlu1 %282  ;;  %v273_v37 = vpop.permute.xlu0 %272 }
  0xad   : > { %v309_v43 = vmul.f32 %v1195_v41, %v283_v36  ;;  %v307_v54 = vmul.f32 %v1195_v41, %v273_v37 }
  0xaf   : > { %v377_v39 = vpop.permute.xlu2 %376  ;;  %v366_v48 = vadd.f32 %v358_v42, %v309_v43 }
  0xb0   : > { %v405_v55 = vmul.f32 %v1199_v44, %v377_v39 }
  0xb4   : > { %v303_v45 = vpop.permute.xlu1 %302  ;;  %v1201_v46 = vpop.permute.xlu0 %297 }
  0xb5   : > { %v313_v21 = vmul.f32 %v1195_v41, %v303_v45 }
  0xb7   : > { %v385_v47 = vpop.permute.xlu2 %384 }
  0xb8   : > { %v407_v49 = vmul.f32 %v1199_v44, %v385_v47  ;;  %v311_v47 = vmul.f32 %v1195_v41, %v1188_v31 }
  0xba   : > { %v415_v50 = vadd.f32 %v407_v49, %v366_v48 }
  0xbc   : > { %v439_v51 = vsel %vm240_vm3, %v415_v50, 0.0 }
  0xbd   : > { %448 = vst [vmem:[%s1207_s25 + $0x18] sm:$0xff] %v439_v51  ;;  %v332_v52 = vpop.permute.xlu1 %331 }
  0xbe   : > { %v328_v53 = vpop.permute.xlu0 %327  ;;  %v357_v62 = vmul.f32 %v1193_v40, %v332_v52 }
  0xbf   : > { %v356_v56 = vmul.f32 %v1193_v40, %v328_v53  ;;  %v389_v57 = vpop.permute.xlu2 %388  ;;  %v473_v53 = vmul.f32 %v439_v51, %v439_v51 }
  0xc0   : > { %v365_v5 = vadd.f32 %v357_v62, %v308_v0  ;;  %v408_v28 = vmul.f32 %v1199_v44, %v389_v57  ;;  %v312_v0 = vmul.f32 %v1195_v41, %v1201_v46 }
  0xc1   : > { %v364_v58 = vadd.f32 %v356_v56, %v307_v54 }
  0xc3   : > { %v413_v61 = vadd.f32 %v405_v55, %v364_v58 }
  0xc5   : > { %v437_v63 = vsel %vm238_vm1, %v413_v61, 0.0 }
  0xc6   : > { %446 = vst [vmem:[%s1207_s25 + $0x8] sm:$0xff] %v437_v63  ;;  %v373_v1 = vpop.permute.xlu1 %372  ;;  %v471_v37 = vmul.f32 %v437_v63, %v437_v63 }
  0xc7   : > { %v404_v3 = vmul.f32 %v1199_v44, %v373_v1  ;;  %v381_v4 = vpop.permute.xlu0 %380 }
  0xc8   : > { %v406_v6 = vmul.f32 %v1199_v44, %v381_v4  ;;  %v352_v7 = vpop.permute.xlu2 %351 }
  0xc9   : > { %v412_v8 = vadd.f32 %v404_v3, %v363_v2  ;;  %v362_v20 = vmul.f32 %v1193_v40, %v352_v7 }
  0xca   : > { %v414_v9 = vadd.f32 %v406_v6, %v365_v5 }
  0xcb   : > { %v436_v18 = vsel %vm237_vm0, %v412_v8, 0.0  ;;  %v370_v26 = vadd.f32 %v362_v20, %v313_v21 }
  0xcc   : > { %445 = vst [vmem:[%s1207_s25] sm:$0xff] %v436_v18  ;;  %v438_v19 = vsel %vm239_vm2, %v414_v9, 0.0  ;;  %v470_v36 = vmul.f32 %v436_v18, %v436_v18  ;;  %v454_v38 = vadd.f32 %v437_v63, %v436_v18 }
  0xcd   : > { %447 = vst [vmem:[%s1207_s25 + $0x10] sm:$0xff] %v438_v19  ;;  %v472_v45 = vmul.f32 %v438_v19, %v438_v19 }
  0xce   : > { %v478_v39 = vadd.f32 %v471_v37, %v470_v36  ;;  %v455_v43 = vadd.f32 %v454_v38, %v438_v19 }
  0xd0   : > { %v340_v22 = vpop.permute.xlu1 %339  ;;  %v479_v48 = vadd.f32 %v478_v39, %v472_v45  ;;  %v456_v54 = vadd.f32 %v455_v43, %v439_v51  ;;  %v348_v56 = vpop.permute.xlu0 %347 }
  0xd1   : > { %v359_v24 = vmul.f32 %v1193_v40, %v340_v22  ;;  %v401_v25 = vpop.permute.xlu2 %400  ;;  %v361_v60 = vmul.f32 %v1193_v40, %v348_v56 }
  0xd2   : > { %v411_v27 = vmul.f32 %v1199_v44, %v401_v25  ;;  %v480_v58 = vadd.f32 %v479_v48, %v473_v53  ;;  %v453_v25 = vld [vmem:[#allocation3] sm:$0x1] }
  0xd3   : > { %v367_v29 = vadd.f32 %v359_v24, %v310_v23  ;;  %v369_v2 = vadd.f32 %v361_v60, %v312_v0 }
  0xd4   : > { %v419_v32 = vadd.f32 %v411_v27, %v370_v26 }
  0xd5   : > { %v416_v33 = vadd.f32 %v408_v28, %v367_v29  ;;  %v469_v28 = vld [vmem:[#allocation3 + $0x1] sm:$0x1] }
  0xd6   : > { %v443_v34 = vsel %vm244_vm7, %v419_v32, 0.0 }
  0xd7   : > { %v440_v35 = vsel %vm241_vm4, %v416_v33, 0.0  ;;  %452 = vst [vmem:[%s1207_s25 + $0x38] sm:$0xff] %v443_v34  ;;  %v477_v7 = vmul.f32 %v443_v34, %v443_v34 }
  0xd8   : > { %449 = vst [vmem:[%s1207_s25 + $0x20] sm:$0xff] %v440_v35  ;;  %v344_v30 = vpop.permute.xlu1 %343  ;;  %v474_v55 = vmul.f32 %v440_v35, %v440_v35  ;;  %v457_v59 = vadd.f32 %v456_v54, %v440_v35 }
  0xd9   : > { %v360_v42 = vmul.f32 %v1193_v40, %v344_v30 }
  0xda   : > { %v481_v63 = vadd.f32 %v480_v58, %v474_v55 }
  0xdb   : > { %v368_v50 = vadd.f32 %v360_v42, %v311_v47 }
  0xe1   : > { %v393_v49 = vpop.permute.xlu1 %392 }
  0xe2   : > { %v409_v52 = vmul.f32 %v1199_v44, %v393_v49 }
  0xe4   : > { %v417_v57 = vadd.f32 %v409_v52, %v368_v50 }
  0xe6   : > { %v441_v61 = vsel %vm242_vm5, %v417_v57, 0.0 }
  0xe7   : > { %450 = vst [vmem:[%s1207_s25 + $0x28] sm:$0xff] %v441_v61  ;;  %v458_v31 = vadd.f32 %v457_v59, %v441_v61  ;;  %v475_v62 = vmul.f32 %v441_v61, %v441_v61 }
  0xe9   : > { %v482_v1 = vadd.f32 %v481_v63, %v475_v62  ;;  %v397_v51 = vpop.permute.xlu1 %396 }
  0xea   : > { %v410_v3 = vmul.f32 %v1199_v44, %v397_v51 }
  0xec   : > { %v418_v4 = vadd.f32 %v410_v3, %v369_v2 }
  0xee   : > { %v442_v5 = vsel %vm243_vm6, %v418_v4, 0.0 }
  0xef   : > { %451 = vst [vmem:[%s1207_s25 + $0x30] sm:$0xff] %v442_v5  ;;  %v459_v40 = vadd.f32 %v458_v31, %v442_v5  ;;  %v476_v6 = vmul.f32 %v442_v5, %v442_v5 }
  0xf1   : > { %v460_v8 = vadd.f32 %v459_v40, %v443_v34  ;;  %v483_v9 = vadd.f32 %v482_v1, %v476_v6 }
  0xf3   : > { %v461_v18 = vrot.slane %v460_v8, 4  ;;  %v484_v19 = vadd.f32 %v483_v9, %v477_v7 }
  0xf5   : > { %v462_v20 = vadd.f32 %v461_v18, %v460_v8  ;;  %v485_v21 = vrot.slane %v484_v19, 4 }
  0xf7   : > { %v463_v41 = vrot.slane %v462_v20, 2  ;;  %v486_v46 = vadd.f32 %v485_v21, %v484_v19 }
  0xf9   : > { %v464_v22 = vadd.f32 %v463_v41, %v462_v20  ;;  %v487_v23 = vrot.slane %v486_v46, 2 }
  0xfb   : > { %v465_v24 = vrot.slane %v464_v22, 1  ;;  %v488_v44 = vadd.f32 %v487_v23, %v486_v46 }
  0xfd   : > { %v466_v26 = vadd.f32 %v465_v24, %v464_v22  ;;  %v489_v27 = vrot.slane %v488_v44, 1 }
  0xff   : > { %v467_v29 = vadd.f32 %v466_v26, %v453_v25  ;;  %v490_v32 = vadd.f32 %v489_v27, %v488_v44 }
 0x101   : > { %468 = vst [vmem:[#allocation3] sm:$0x1] %v467_v29  ;;  %v491_v33 = vadd.f32 %v490_v32, %v469_v28 }
 0x103   : > { %492 = vst [vmem:[#allocation3 + $0x1] sm:$0x1] %v491_v33 }
 0x104 PF: > { %p493_p4 = scmp.eq.s32.totalorder %s999_s19, 1 }
 0x106   : > { %p494_p6 = pnand %p493_p4, %p246_p1 }
 0x107   : > { %s1026_s11 = smov (!%p494_p6), 0.0  }
 0x108   : > { %497 = sbr.rel (%p494_p6) target bundleno = 535 (0x217), region = 48 }
 0x10d   : > { %v498_v34 = vld [vmem:[#allocation3] sm:$0x1]  ;;  %vm499_vm8 = vcmask 1040384   ;;  %v519_v30 = vld [vmem:[#allocation3 + $0x1] sm:$0x1]  ;;  %v1025_v37 = vmov 2016.0  }
 0x10e   : > { %v500_v35 = vsel %vm499_vm8, %v498_v34, 0.0  ;;  %v520_v36 = vsel %vm499_vm8, %v519_v30, 0.0  ;;  %901 = vrcp.f32 %v1025_v37 }
 0x10f   : > { %501 = vadd.xlane.f32.xlu0 %v500_v35 }
 0x114   : > { %v902_v38 = vpop.eup %901 }
 0x115   : > { %v511_v39 = vmul.f32 2016.0, %v902_v38  ;;  %vm515_vm9 = vweird.f32 %v902_v38 }
 0x117   : > { %521 = vadd.xlane.f32.xlu0 %v520_v36  ;;  %v512_v42 = vsub.f32 1.0, %v511_v39 }
 0x119   : > { %v513_v48 = vmul.f32 %v902_v38, %v512_v42 }
 0x11b   : > { %v514_v52 = vadd.f32 %v902_v38, %v513_v48 }
 0x11d   : > { %v516_v58 = vsel %vm515_vm9, %v902_v38, %v514_v52 }
 0x182   : > { %v502_v43 = vpop.xlane.xlu0 %501 }
 0x183   : > { %v503_v45 = vrot.slane %v502_v43, 4 }
 0x185   : > { %v504_v47 = vadd.f32 %v503_v45, %v502_v43 }
 0x187   : > { %v505_v49 = vrot.slane %v504_v47, 2 }
 0x189   : > { %v506_v50 = vadd.f32 %v505_v49, %v504_v47 }
 0x18a   : > { %v522_v53 = vpop.xlane.xlu0 %521 }
 0x18b   : > { %v523_v54 = vrot.slane %v522_v53, 4  ;;  %v507_v55 = vrot.slane %v506_v50, 1 }
 0x18d   : > { %v524_v56 = vadd.f32 %v523_v54, %v522_v53  ;;  %v508_v57 = vadd.f32 %v507_v55, %v506_v50 }
 0x18f   : > { %v525_v59 = vrot.slane %v524_v56, 2  ;;  %783 = vpush %v508_v57 }
 0x190   : > { %785 = vpush %v516_v58 }
 0x191   : > { %v526_v60 = vadd.f32 %v525_v59, %v524_v56 }
 0x193   : > { %v527_v61 = vrot.slane %v526_v60, 1 }
 0x195   : > { %v528_v31 = vadd.f32 %v527_v61, %v526_v60 }
 0x197   : > { %787 = vpush %v528_v31 }
 0x1c0   : > { %s784_s28 = spop %783 }
 0x1c1   : > { %s786_s6 = spop %785 }
 0x1c2   : > { %s518_s7 = smul.f32 %s786_s6, %s784_s28 }
 0x1c4   : > { %v542_v62 = vstv %s518_s7  ;;  %s539_s9 = smul.f32 %s518_s7, %s518_s7 }
 0x1c5   : > { %543 = vst [vmem:[#allocation4] sm:$0x1] %v542_v62 }
 0x1c8   : > { %s788_s12 = spop %787 }
 0x1c9   : > { %s538_s14 = smul.f32 %s788_s12, %s786_s6 }
 0x1cb   : > { %s540_s25 = ssub.f32 %s538_s14, %s539_s9 }
 0x1cd   : > { %s541_s0 = smax.f32 %s1026_s11, %s540_s25 }
 0x1ce   : > { %s544_s1 = sadd.f32 1e-05, %s541_s0 }
 0x1d0   : > { %v545_v63 = vstv %s544_s1 }
 0x1d1   : > { %903 = vrsqrt.f32 %v545_v63  ;;  %vm552_vm11 = vweird.f32 %v545_v63 }
 0x1d7   : > { %v904_v0 = vpop.eup %903 }
 0x1d8   : > { %v547_v1 = vmul.f32 %v904_v0, %v545_v63  ;;  %vm553_vm10 = vweird.f32 %v904_v0 }
 0x1d9   : > { %vm554_vm12 = vmor %vm552_vm11, %vm553_vm10 }
 0x1da   : > { %v548_v51 = vmul.f32 %v904_v0, %v547_v1 }
 0x1dc   : > { %v549_v2 = vmul.f32 0.5, %v548_v51 }
 0x1de   : > { %v550_v3 = vsub.f32 1.5, %v549_v2 }
 0x1e0   : > { %v551_v4 = vmul.f32 %v904_v0, %v550_v3 }
 0x1e2   : > { %v555_v5 = vsel %vm554_vm12, %v904_v0, %v551_v4 }
 0x1e3   : > { %789 = vpush %v555_v5 }
 0x214   : > { %s790_s28 = spop %789 }
 0x215   : > { %v557_v40 = vstv %s790_s28 }
 0x216   : > { %558 = vst [vmem:[#allocation5] sm:$0x1] %v557_v40 }
 0x217 PF: > { %p775_p8 = scmp.ne.s32.totalorder %s999_s19, 1 }
 0x218   : > { %s562_s0 = scalar_lea.vmem (!%p775_p8), [#allocation2], %s1146_s13  ;;  %s1354_s2 = sld [smem:[#allocation11_spill]] (!%p775_p8) }
 0x219   : > { %561 = sbr.rel (%p775_p8) target bundleno = 563 (0x233), region = 52 }
 0x21e   : > { %v905_v6 = vld [vmem:[#allocation4] ss:$0 sm:$0xff]  ;;  %v906_v8 = vld [vmem:[#allocation5] ss:$0 sm:$0xff]  ;;  %v907_v18 = vld [vmem:[%s1354_s2] ss:$0 sm:$0xff] }
 0x21f   : > { %v563_v7 = vld [vmem:[%s562_s0] sm:$0xff]  ;;  %v564_v20 = vld [vmem:[%s562_s0 + $0x8] sm:$0xff]  ;;  %v565_v21 = vld [vmem:[%s562_s0 + $0x10] sm:$0xff] }
 0x220   : > { %v575_v9 = vsub.f32 %v563_v7, %v905_v6  ;;  %v908_v19 = vld [vmem:[%s1344_s3] ss:$0 sm:$0xff]  ;;  %v576_v46 = vsub.f32 %v564_v20, %v905_v6  ;;  %v577_v22 = vsub.f32 %v565_v21, %v905_v6  ;;  %v566_v23 = vld [vmem:[%s562_s0 + $0x18] sm:$0xff]  ;;  %v568_v44 = vld [vmem:[%s562_s0 + $0x28] sm:$0xff] }
 0x221   : > { %v567_v24 = vld [vmem:[%s562_s0 + $0x20] sm:$0xff]  ;;  %v578_v25 = vsub.f32 %v566_v23, %v905_v6  ;;  %v580_v27 = vsub.f32 %v568_v44, %v905_v6  ;;  %v569_v28 = vld [vmem:[%s562_s0 + $0x30] sm:$0xff]  ;;  %v570_v29 = vld [vmem:[%s562_s0 + $0x38] sm:$0xff] }
 0x222   : > { %v587_v41 = vmul.f32 %v906_v8, %v575_v9  ;;  %v579_v26 = vsub.f32 %v567_v24, %v905_v6  ;;  %v588_v33 = vmul.f32 %v906_v8, %v576_v46  ;;  %v589_v34 = vmul.f32 %v906_v8, %v577_v22 }
 0x223   : > { %v581_v35 = vsub.f32 %v569_v28, %v905_v6  ;;  %v590_v30 = vmul.f32 %v906_v8, %v578_v25  ;;  %v592_v37 = vmul.f32 %v906_v8, %v580_v27  ;;  %v582_v38 = vsub.f32 %v570_v29, %v905_v6 }
 0x224   : > { %v599_v32 = vmul.f32 %v907_v18, %v587_v41  ;;  %v591_v36 = vmul.f32 %v906_v8, %v579_v26  ;;  %v600_v42 = vmul.f32 %v907_v18, %v588_v33  ;;  %v601_v43 = vmul.f32 %v907_v18, %v589_v34 }
 0x225   : > { %v593_v45 = vmul.f32 %v906_v8, %v581_v35  ;;  %v602_v47 = vmul.f32 %v907_v18, %v590_v30  ;;  %v604_v49 = vmul.f32 %v907_v18, %v592_v37  ;;  %v594_v50 = vmul.f32 %v906_v8, %v582_v38 }
 0x226   : > { %v611_v39 = vadd.f32 %v908_v19, %v599_v32  ;;  %v603_v48 = vmul.f32 %v907_v18, %v591_v36  ;;  %v612_v53 = vadd.f32 %v908_v19, %v600_v42  ;;  %v613_v54 = vadd.f32 %v908_v19, %v601_v43 }
 0x227   : > { %v605_v55 = vmul.f32 %v907_v18, %v593_v45  ;;  %v614_v56 = vadd.f32 %v908_v19, %v602_v47  ;;  %v616_v58 = vadd.f32 %v908_v19, %v604_v49  ;;  %v606_v59 = vmul.f32 %v907_v18, %v594_v50 }
 0x228   : > { %v619_v52 = vmax.f32 %v611_v39, 0.0  ;;  %v615_v57 = vadd.f32 %v908_v19, %v603_v48  ;;  %v620_v61 = vmax.f32 %v612_v53, 0.0  ;;  %v621_v31 = vmax.f32 %v613_v54, 0.0 }
 0x229   : > { %v617_v62 = vadd.f32 %v908_v19, %v605_v55  ;;  %v622_v63 = vmax.f32 %v614_v56, 0.0  ;;  %v624_v1 = vmax.f32 %v616_v58, 0.0  ;;  %v618_v51 = vadd.f32 %v908_v19, %v606_v59 }
 0x22a   : > { %v643_v60 = vsel %vm237_vm0, %v619_v52, 0.0  ;;  %v623_v0 = vmax.f32 %v615_v57, 0.0  ;;  %v644_v2 = vsel %vm238_vm1, %v620_v61, 0.0  ;;  %v645_v10 = vsel %vm239_vm2, %v621_v31, 0.0 }
 0x22b   : > { %651 = vst [vmem:[%s1184_s8] sm:$0xff] %v643_v60  ;;  %v625_v3 = vmax.f32 %v617_v62, 0.0  ;;  %v646_v4 = vsel %vm240_vm3, %v622_v63, 0.0  ;;  %v626_v40 = vmax.f32 %v618_v51, 0.0  ;;  %v648_v6 = vsel %vm242_vm5, %v624_v1, 0.0 }
 0x22c   : > { %652 = vst [vmem:[%s1184_s8 + $0x8] sm:$0xff] %v644_v2  ;;  %v647_v5 = vsel %vm241_vm4, %v623_v0, 0.0 }
 0x22d   : > { %653 = vst [vmem:[%s1184_s8 + $0x10] sm:$0xff] %v645_v10  ;;  %v649_v11 = vsel %vm243_vm6, %v625_v3, 0.0  ;;  %v650_v12 = vsel %vm244_vm7, %v626_v40, 0.0 }
 0x22e   : > { %654 = vst [vmem:[%s1184_s8 + $0x18] sm:$0xff] %v646_v4 }
 0x22f   : > { %655 = vst [vmem:[%s1184_s8 + $0x20] sm:$0xff] %v647_v5 }
 0x230   : > { %656 = vst [vmem:[%s1184_s8 + $0x28] sm:$0xff] %v648_v6 }
 0x231   : > { %657 = vst [vmem:[%s1184_s8 + $0x30] sm:$0xff] %v649_v11 }
 0x232   : > { %658 = vst [vmem:[%s1184_s8 + $0x38] sm:$0xff] %v650_v12 }
 0x233 PF: > { %s777_s19 = sshll.u32 %s995_s18, 3  ;;  %s778_s13 = sshll.u32 %s1003_s20, 4 }
 0x234   : > { %s674_s9 = sshll.u32 %s1184_s8, 4  ;;  %s671_s12 = sadd.s32 %s778_s13, %s777_s19  ;;  %s675_s9 = int_to_ptr.vmem [resolvable:$true] %s674_s9 }
 0x235   : > { %s779_s14 = sshll.u32 %s671_s12, 3  ;;  %s1355_s11 = sand.u32 1, %s987_s16  }
 0x236   : > { %s673_s0 = scalar_lea.hbm %s1345_s4, %s779_s14  ;;  %s660_s6 = scalar_lea.sflag [#allocation7], %s1355_s11 }
 0x237   : > { %s676_s1 = sshll.u32 %s673_s0, 4  ;;  %s929_s8 = scalar_lea.hbm %s1345_s4, 256  ;;  %s677_s1 = int_to_ptr.hbm [resolvable:$true] %s676_s1 }
 0x238   : > { %s923_s7 = sshra.s32 %s677_s1, 4  ;;  %s924_s7 = int_to_ptr.hbm [resolvable:$true] %s923_s7 }
 0x239   : > { %s925_s2 = scalar_lea.hbm %s924_s7, 64  ;;  %p930_p12 = scmp.lt.s32.totalorder %s924_s7, %s1345_s4 }
 0x23a   : > { %p926_p9 = scmp.ne.s32.totalorder %s924_s7, %s925_s2  ;;  %p931_p13 = scmp.lt.s32.totalorder %s929_s8, %s925_s2 }
 0x23c   : > { %p927_p10 = pnand %p926_p9, %p1116_p5  ;;  %p932_p0 = por %p931_p13, %p930_p12 }
 0x23e   : > { %p928_p11 = pneg %p927_p10 }
 0x240   : > { %p933_p1 = pnand %p932_p0, %p928_p11 }
 0x242   : > { %936 = shalt.err (!%p933_p1)
}
 0x243   : > { %s1027_s12 = smov 128   ;;  %s1028_s14 = smov 8  }
 0x244   : > { %791 = dma.vmem_to_hbm [thread:$0]  (%p1116_p5), %s675_s9, 1024, %s677_s1, %s660_s6, %s1027_s12, %s1027_s12, %s1028_s14  }
 0x245 PF: > { %p797_p2 = scmp.ge.s32.totalorder %s1019_s24, 2  ;;  %s691_s25 = sand.u32 1, %s983_s15  }
 0x246   : > { %s692_s28 = scalar_lea.sflag [#allocation7], %s691_s25 }
 0x247   : > { %p794_p3 = pnand %p797_p2, %p1123_p7 }
 0x249   : > { %p795_p4 = pneg %p794_p3 }
 0x24b   : > { %978 = dma.done.wait (%p795_p4), %s692_s28, 1024  }
 0x24c   : > { %980 = vsyncadd (%p795_p4), %s692_s28, 4294966272  ;;  %s17_s24 = sadd.s32 1, %s1019_s24   ;;  %s1356_s15 = smov %s987_s16 }
 0x24d   : > { %p14_p6 = scmp.ge.s32.totalorder %s17_s24, 10   ;;  %s1357_s16 = smov %s991_s17 }
 0x24e   : > { %s1358_s17 = smov %s1137_s10  ;;  %s1359_s18 = smov %s1007_s21 }
 0x24f   : > { %s1360_s19 = smov %s1011_s22  ;;  %s1361_s20 = smov %s1015_s23 }
 0x250   : > { %s1362_s21 = smov %s1366_s26  ;;  %s1363_s22 = smov %s1370_s27 }
 0x251   : > { %s1364_s23 = smov %s1374_s29  ;;  %16 = sbr.rel (!%p14_p6) target bundleno = 10 (0xa), region = 90 }
 0x256   :  { %698 = vsyncpa [#allocation7], 1 }
 0x257   :  { %700 = vsyncpa [#allocation7 + $0x1], 1 }

</bundles_post_ra>
